<compile_context>
chip_gen: v6e
topology: v6e:2x2x1
jax: 0.10.0
libtpu: 0.0.40
codegen_flags: <defaults>
</compile_context>

<pallas_src>
import functools

import jax
import jax.numpy as jnp
from jax.experimental import pallas as pl
from jax.experimental.pallas import tpu as pltpu


def _round_up(x: int, m: int) -> int:
    return (x + m - 1) // m * m


def _vmem_capacity_bytes() -> int:
    """Physical per-TensorCore VMEM, with a conservative (v7x) fallback."""
    try:
        cap = int(pltpu.get_tpu_info().vmem_capacity_bytes)
        if cap > 0:
            return cap
    except Exception:
        pass
    return 64 * 1024 * 1024


def _pick_tm(n: int, tm_cap: int) -> int:
    """Row-tile size: as large as allowed while keeping padded rows small."""
    n8 = _round_up(n, 8)
    if n8 <= tm_cap:
        return n8
    cands = [c for c in (1024, 512, 256, 128, 64) if c <= tm_cap] or [64]
    for c in cands:                              # largest tile wasting < n/8 rows
        if ((-n) % c) * 8 <= n:
            return c
    return min(cands, key=lambda c: ((-n) % c, -c))


def pack_highway_params(w_hg, b_hg, *, weight_dtype=jnp.bfloat16):
    """Pack per-layer Linear params for the kernel.  Call ONCE at init time.

    w_hg: (L, D, 2D)  transposed nn.Linear weights (projection is x @ W);
                      columns [:D] = nonlinear path, [D:] = gate.
    b_hg: (L, 2D)     biases (gate half pre-filled with 1.0, as in PyTorch).

    Returns:
      w_p: (L, D, 2*Dp) weight_dtype; each half's output columns padded to
           Dp = round_up(D, 128) so the nonlinear/gate split is lane-aligned.
      b_p: (L, 1, 2*Dp) float32.
    """
    num_layers, d, two_d = w_hg.shape
    assert two_d == 2 * d, "w_hg must be (L, D, 2D)"
    dp = _round_up(d, 128)
    if dp == d:                                  # already lane-aligned: no pad pass
        w_p = w_hg.astype(weight_dtype)
        b_p = b_hg.reshape(num_layers, 1, 2 * d).astype(jnp.float32)
    else:
        w_p = jnp.zeros((num_layers, d, 2 * dp), weight_dtype)
        w_p = w_p.at[:, :, :d].set(w_hg[:, :, :d].astype(weight_dtype))
        w_p = w_p.at[:, :, dp:dp + d].set(w_hg[:, :, d:].astype(weight_dtype))
        b_p = jnp.zeros((num_layers, 1, 2 * dp), jnp.float32)
        b_p = b_p.at[:, 0, :d].set(b_hg[:, :d].astype(jnp.float32))
        b_p = b_p.at[:, 0, dp:dp + d].set(b_hg[:, d:].astype(jnp.float32))
    return w_p, b_p


def _highway_resident_kernel(x_ref, w_ref, b_ref, out_ref, *,
                             num_layers, d, d_pad, unroll):
    """All layers fused on one resident (TM, D) activation tile.

    x_ref:   (TM, D)         activation tile (pipelined over the row grid)
    w_ref:   (L, D, 2*Dp)    stacked fused [W_h | W_g] weights (bf16, resident)
    b_ref:   (L, 1, 2*Dp)    stacked fused biases (f32, resident)
    out_ref: (TM, D)
    """
    def layer(l, x):
        # One wide MXU matmul for both paths (bf16 operands, f32 accumulate).
        proj = jnp.dot(x.astype(w_ref.dtype), w_ref[l],
                       preferred_element_type=jnp.float32) + b_ref[l]
        # 128-aligned halves; only the first d lanes of each half are real.
        nonlinear = jnp.maximum(proj[:, :d], 0.0)            # relu path (VPU)
        gate = jax.nn.sigmoid(proj[:, d_pad:d_pad + d])      # gate path (EUP)
        # gate*x + (1-gate)*nonlinear == nonlinear + gate*(x - nonlinear)
        return nonlinear + gate * (x - nonlinear)

    x0 = x_ref[...].astype(jnp.float32)
    y = jax.lax.fori_loop(0, num_layers, layer, x0, unroll=unroll)
    out_ref[...] = y.astype(out_ref.dtype)


def _highway_stream_kernel(x_ref, w_ref, b_ref, out_ref, acc_ref, *, d, d_pad):
    """Layer-streaming fallback: one layer per inner grid step.

    Grid: (row_tiles, num_layers), layer axis innermost ("arbitrary").
    Activation is carried in a VMEM scratch; only ~2 layer-weight buffers
    are ever live, so arbitrarily deep stacks fit v7x's 64 MiB/TC.
    """
    l = pl.program_id(1)

    @pl.when(l == 0)
    def _():
        acc_ref[...] = x_ref[...].astype(jnp.float32)

    x = acc_ref[...]
    proj = jnp.dot(x.astype(w_ref.dtype), w_ref[0],
                   preferred_element_type=jnp.float32) + b_ref[0]
    nonlinear = jnp.maximum(proj[:, :d], 0.0)
    gate = jax.nn.sigmoid(proj[:, d_pad:d_pad + d])
    acc_ref[...] = nonlinear + gate * (x - nonlinear)

    @pl.when(l == pl.num_programs(1) - 1)
    def _():
        out_ref[...] = acc_ref[...].astype(out_ref.dtype)


@functools.partial(jax.jit, static_argnames=("force_stream",))
def highway_forward(x, w_p, b_p, *, force_stream=False):
    """Stacked highway layers.

    x:   (N, D) activations.
    w_p: (L, D, 2*Dp), b_p: (L, 1, 2*Dp) from pack_highway_params (built once).
    """
    n, d = x.shape
    num_layers, d_w, two_dp = w_p.shape
    assert d_w == d, "packed weights do not match the input feature dim"
    d_pad = two_dp // 2

    w_bytes = w_p.size * w_p.dtype.itemsize
    b_bytes = b_p.size * b_p.dtype.itemsize
    act_bytes = x.dtype.itemsize

    # Budget against *per-core* VMEM: each TensorCore holds its own copy of
    # anything resident (64 MiB on v7x, 128 MiB on v5e/v6e).
    vmem_cap = _vmem_capacity_bytes()
    resident_weight_cost = 2 * (w_bytes + b_bytes)    # pipeline double-buffers
    use_stream = force_stream or resident_weight_cost > int(0.35 * vmem_cap)

    tm_cap = 1024 if vmem_cap >= 96 * 1024 * 1024 else 512
    tm = _pick_tm(n, tm_cap)
    grid_rows = pl.cdiv(n, tm)

    unroll = num_layers if num_layers <= 4 else 2

    cost = pl.CostEstimate(
        flops=2 * num_layers * n * d * (2 * d_pad) + 6 * num_layers * n * d,
        transcendentals=num_layers * n * d,
        bytes_accessed=2 * n * d * act_bytes + w_bytes + b_bytes,
    )

    if not use_stream:
        # ---- all-layers-resident path (weights read from HBM exactly once) --
        live_tmp = (unroll + 2) * tm * 2 * d_pad * 4       # live (TM, 2Dp) f32 temps
        vmem_needed = (resident_weight_cost
                       + 2 * 2 * tm * d * act_bytes        # double-buffered x / out tiles
                       + live_tmp
                       + (2 << 20))
        vmem_limit = min(max(vmem_needed, 32 * 1024 * 1024), int(0.9 * vmem_cap))

        kernel = functools.partial(_highway_resident_kernel,
                                   num_layers=num_layers, d=d, d_pad=d_pad,
                                   unroll=unroll)
        return pl.pallas_call(
            kernel,
            out_shape=jax.ShapeDtypeStruct((n, d), x.dtype),
            grid_spec=pltpu.PrefetchScalarGridSpec(
                num_scalar_prefetch=0,
                grid=(grid_rows,),
                in_specs=[
                    pl.BlockSpec((tm, d), lambda i: (i, 0)),                        # x tile
                    pl.BlockSpec((num_layers, d, 2 * d_pad), lambda i: (0, 0, 0)),  # W (resident)
                    pl.BlockSpec((num_layers, 1, 2 * d_pad), lambda i: (0, 0, 0)),  # b (resident)
                ],
                out_specs=pl.BlockSpec((tm, d), lambda i: (i, 0)),
            ),
            compiler_params=pltpu.CompilerParams(
                dimension_semantics=("parallel",),       # row tiles shard across TCs
                vmem_limit_bytes=vmem_limit,
            ),
            cost_estimate=cost,
        )(x, w_p, b_p)

    # ---- layer-streaming fallback (large L*D / v7x) -------------------------
    per_layer_w = d * 2 * d_pad * w_p.dtype.itemsize + 2 * d_pad * b_p.dtype.itemsize
    vmem_needed = (2 * per_layer_w                       # double-buffered layer weights
                   + 2 * 2 * tm * d * act_bytes          # double-buffered x / out tiles
                   + tm * d * 4                          # activation scratch
                   + 4 * tm * 2 * d_pad * 4              # live (TM, 2Dp) temporaries
                   + (2 << 20))
    vmem_limit = min(max(vmem_needed, 32 * 1024 * 1024), int(0.9 * vmem_cap))

    kernel = functools.partial(_highway_stream_kernel, d=d, d_pad=d_pad)
    return pl.pallas_call(
        kernel,
        out_shape=jax.ShapeDtypeStruct((n, d), x.dtype),
        grid_spec=pltpu.PrefetchScalarGridSpec(
            num_scalar_prefetch=0,
            grid=(grid_rows, num_layers),
            in_specs=[
                pl.BlockSpec((tm, d), lambda i, l: (i, 0)),                # x tile
                pl.BlockSpec((1, d, 2 * d_pad), lambda i, l: (l, 0, 0)),   # layer-l W
                pl.BlockSpec((1, 1, 2 * d_pad), lambda i, l: (l, 0, 0)),   # layer-l b
            ],
            out_specs=pl.BlockSpec((tm, d), lambda i, l: (i, 0)),
            scratch_shapes=[pltpu.VMEM((tm, d), jnp.float32)],             # carried activation
        ),
        compiler_params=pltpu.CompilerParams(
            dimension_semantics=("parallel", "arbitrary"),
            vmem_limit_bytes=vmem_limit,
        ),
        cost_estimate=cost,
    )(x, w_p, b_p)


def init_highway_params(key, input_dim, num_layers):
    """Mimics nn.Linear(D, 2D) per layer, with the gate bias filled with 1.0.

    Returns (w_hg, b_hg): w_hg is (L, D, 2D) (already transposed so the
    projection is x @ W), b_hg is (L, 2D).
    """
    bound = 1.0 / float(input_dim) ** 0.5
    ws, bs = [], []
    for _ in range(num_layers):
        key, kw, kb = jax.random.split(key, 3)
        w = jax.random.uniform(kw, (input_dim, 2 * input_dim),
                               minval=-bound, maxval=bound, dtype=jnp.float32)
        b = jax.random.uniform(kb, (2 * input_dim,),
                               minval=-bound, maxval=bound, dtype=jnp.float32)
        b = b.at[input_dim:].set(1.0)        # layer.bias[input_dim:].data.fill_(1)
        ws.append(w)
        bs.append(b)
    return jnp.stack(ws), jnp.stack(bs)


def highway_reference(x, w_hg, b_hg, matmul_dtype=jnp.float32):
    """Pure-JAX reference matching Highway.forward (optionally bf16 matmuls)."""
    d = x.shape[1]
    cur = x
    for l in range(w_hg.shape[0]):
        proj = jnp.dot(cur.astype(matmul_dtype), w_hg[l].astype(matmul_dtype),
                       preferred_element_type=jnp.float32) + b_hg[l]
        nonlinear = jax.nn.relu(proj[:, :d])
        gate = jax.nn.sigmoid(proj[:, d:])
        cur = gate * cur + (1.0 - gate) * nonlinear
    return cur


if __name__ == "__main__":
    input_dim = 32
    num_layers = 2
    batch = 8

    key = jax.random.PRNGKey(0)
    key, kx = jax.random.split(key)
    x = jax.random.normal(kx, (batch, input_dim), dtype=jnp.float32)

    w_hg, b_hg = init_highway_params(key, input_dim, num_layers)
    w_p, b_p = pack_highway_params(w_hg, b_hg)        # packed ONCE, outside forward

    out = jax.block_until_ready(highway_forward(x, w_p, b_p))
    out_stream = jax.block_until_ready(
        highway_forward(x, w_p, b_p, force_stream=True))   # exercise v7x fallback path

    ref_bf16 = highway_reference(x, w_hg, b_hg, matmul_dtype=jnp.bfloat16)
    ref_f32 = highway_reference(x, w_hg, b_hg)

    assert out.shape == (batch, input_dim)
    assert jnp.allclose(out, ref_bf16, atol=2e-3, rtol=2e-3), "resident path mismatch"
    assert jnp.allclose(out_stream, ref_bf16, atol=2e-3, rtol=2e-3), "stream path mismatch"
    assert jnp.allclose(out, ref_f32, atol=5e-2, rtol=5e-2), "drift vs f32 reference"

    print("KERNEL_OK")
</pallas_src>

<mosaic_0001>
module attributes {stable_mosaic.version = 11 : i64} {
  func.func @_highway_resident_kernel(%arg0: i32, %arg1: memref<8x32xf32, #tpu.memory_space<vmem>>, %arg2: memref<2x32x256xbf16, #tpu.memory_space<vmem>>, %arg3: memref<2x1x256xf32, #tpu.memory_space<vmem>>, %arg4: memref<8x32xf32, #tpu.memory_space<vmem>>) attributes {dimension_semantics = [#tpu.dimension_semantics<parallel>], iteration_bounds = array<i64: 1>, scalar_prefetch = 0 : i64, scratch_operands = 0 : i64, tpu.core_type = #tpu.core_type<tc>, window_params = [{transform_indices = @transform_0, window_bounds = array<i64: 8, 32>}, {pipeline_mode = #tpu.pipeline_mode<synchronous>, transform_indices = @transform_1, window_bounds = array<i64: 2, 32, 256>}, {pipeline_mode = #tpu.pipeline_mode<synchronous>, transform_indices = @transform_2, window_bounds = array<i64: 2, 1, 256>}, {transform_indices = @transform_3, window_bounds = array<i64: 8, 32>}]} {
    %c0 = arith.constant 0 : index
    %c0_0 = arith.constant 0 : index
    %0 = vector.load %arg1[%c0, %c0_0] : memref<8x32xf32, #tpu.memory_space<vmem>>, vector<8x32xf32>
    %c0_i32 = arith.constant 0 : i32
    %1 = arith.truncf %0 : vector<8x32xf32> to vector<8x32xbf16>
    %2 = arith.index_cast %c0_i32 : i32 to index
    %c0_1 = arith.constant 0 : index
    %c0_2 = arith.constant 0 : index
    %3 = vector.load %arg2[%2, %c0_1, %c0_2] : memref<2x32x256xbf16, #tpu.memory_space<vmem>>, vector<1x32x256xbf16>
    %4 = vector.shape_cast %3 : vector<1x32x256xbf16> to vector<32x256xbf16>
    %cst = arith.constant dense<0.000000e+00> : vector<8x256xf32>
    %5 = tpu.matmul %1, %4, %cst {dimension_numbers = #tpu.dot_dimension_numbers<[1], [0], [0], [1], [0, 0, 1, 1], [], []>} : vector<8x32xbf16>, vector<32x256xbf16>, vector<8x256xf32> -> vector<8x256xf32>
    %6 = arith.index_cast %c0_i32 : i32 to index
    %c0_3 = arith.constant 0 : index
    %c0_4 = arith.constant 0 : index
    %7 = vector.load %arg3[%6, %c0_3, %c0_4] : memref<2x1x256xf32, #tpu.memory_space<vmem>>, vector<1x1x256xf32>
    %8 = vector.shape_cast %7 : vector<1x1x256xf32> to vector<1x256xf32>
    %9 = vector.broadcast %8 : vector<1x256xf32> to vector<8x256xf32>
    %10 = arith.addf %5, %9 : vector<8x256xf32>
    %11 = vector.extract_strided_slice %10 {offsets = [0, 0], sizes = [8, 32], strides = [1, 1]} : vector<8x256xf32> to vector<8x32xf32>
    %cst_5 = arith.constant 0.000000e+00 : f32
    %12 = vector.broadcast %cst_5 : f32 to vector<8x32xf32>
    %13 = arith.maximumf %11, %12 : vector<8x32xf32>
    %14 = vector.extract_strided_slice %10 {offsets = [0, 128], sizes = [8, 32], strides = [1, 1]} : vector<8x256xf32> to vector<8x32xf32>
    %15 = arith.negf %14 : vector<8x32xf32>
    %16 = math.exp %15 : vector<8x32xf32>
    %cst_6 = arith.constant 1.000000e+00 : f32
    %17 = vector.broadcast %cst_6 : f32 to vector<8x32xf32>
    %18 = arith.addf %17, %16 : vector<8x32xf32>
    %19 = arith.divf %17, %18 : vector<8x32xf32>
    %20 = arith.subf %0, %13 : vector<8x32xf32>
    %21 = arith.mulf %19, %20 : vector<8x32xf32>
    %22 = arith.addf %13, %21 : vector<8x32xf32>
    %c1_i32 = arith.constant 1 : i32
    %23 = arith.truncf %22 : vector<8x32xf32> to vector<8x32xbf16>
    %24 = arith.index_cast %c1_i32 : i32 to index
    %c0_7 = arith.constant 0 : index
    %c0_8 = arith.constant 0 : index
    %25 = vector.load %arg2[%24, %c0_7, %c0_8] : memref<2x32x256xbf16, #tpu.memory_space<vmem>>, vector<1x32x256xbf16>
    %26 = vector.shape_cast %25 : vector<1x32x256xbf16> to vector<32x256xbf16>
    %cst_9 = arith.constant dense<0.000000e+00> : vector<8x256xf32>
    %27 = tpu.matmul %23, %26, %cst_9 {dimension_numbers = #tpu.dot_dimension_numbers<[1], [0], [0], [1], [0, 0, 1, 1], [], []>} : vector<8x32xbf16>, vector<32x256xbf16>, vector<8x256xf32> -> vector<8x256xf32>
    %28 = arith.index_cast %c1_i32 : i32 to index
    %c0_10 = arith.constant 0 : index
    %c0_11 = arith.constant 0 : index
    %29 = vector.load %arg3[%28, %c0_10, %c0_11] : memref<2x1x256xf32, #tpu.memory_space<vmem>>, vector<1x1x256xf32>
    %30 = vector.shape_cast %29 : vector<1x1x256xf32> to vector<1x256xf32>
    %31 = vector.broadcast %30 : vector<1x256xf32> to vector<8x256xf32>
    %32 = arith.addf %27, %31 : vector<8x256xf32>
    %33 = vector.extract_strided_slice %32 {offsets = [0, 0], sizes = [8, 32], strides = [1, 1]} : vector<8x256xf32> to vector<8x32xf32>
    %cst_12 = arith.constant 0.000000e+00 : f32
    %34 = vector.broadcast %cst_12 : f32 to vector<8x32xf32>
    %35 = arith.maximumf %33, %34 : vector<8x32xf32>
    %36 = vector.extract_strided_slice %32 {offsets = [0, 128], sizes = [8, 32], strides = [1, 1]} : vector<8x256xf32> to vector<8x32xf32>
    %37 = arith.negf %36 : vector<8x32xf32>
    %38 = math.exp %37 : vector<8x32xf32>
    %cst_13 = arith.constant 1.000000e+00 : f32
    %39 = vector.broadcast %cst_13 : f32 to vector<8x32xf32>
    %40 = arith.addf %39, %38 : vector<8x32xf32>
    %41 = arith.divf %39, %40 : vector<8x32xf32>
    %42 = arith.subf %22, %35 : vector<8x32xf32>
    %43 = arith.mulf %41, %42 : vector<8x32xf32>
    %44 = arith.addf %35, %43 : vector<8x32xf32>
    %c2_i32 = arith.constant 2 : i32
    %c0_14 = arith.constant 0 : index
    %c0_15 = arith.constant 0 : index
    %45 = vector.load %arg4[%c0_14, %c0_15] : memref<8x32xf32, #tpu.memory_space<vmem>>, vector<8x32xf32>
    tpu.vector_store %arg4[%c0_14, %c0_15], %44 {strides = array<i32>} : memref<8x32xf32, #tpu.memory_space<vmem>>, vector<8x32xf32>,
    return
  }
  func.func @transform_0(%arg0: i32) -> (i32, i32) {
    %c0_i32 = arith.constant 0 : i32
    %c0_i32_0 = arith.constant 0 : i32
    return %arg0, %c0_i32 : i32, i32
  }
  func.func @transform_1(%arg0: i32) -> (i32, i32, i32) {
    %c0_i32 = arith.constant 0 : i32
    %c0_i32_0 = arith.constant 0 : i32
    %c0_i32_1 = arith.constant 0 : i32
    %c0_i32_2 = arith.constant 0 : i32
    return %c0_i32, %c0_i32_0, %c0_i32_1 : i32, i32, i32
  }
  func.func @transform_2(%arg0: i32) -> (i32, i32, i32) {
    %c0_i32 = arith.constant 0 : i32
    %c0_i32_0 = arith.constant 0 : i32
    %c0_i32_1 = arith.constant 0 : i32
    %c0_i32_2 = arith.constant 0 : i32
    return %c0_i32, %c0_i32_0, %c0_i32_1 : i32, i32, i32
  }
  func.func @transform_3(%arg0: i32) -> (i32, i32) {
    %c0_i32 = arith.constant 0 : i32
    %c0_i32_0 = arith.constant 0 : i32
    return %arg0, %c0_i32 : i32, i32
  }
}

</mosaic_0001>

<bundles_post_ra>
// kernel: highway_forward.1
= control target key start
LH: loop header
LB: loop body
LE: loop exit
PB: predicated region body
PF: predicated region fallthrough
CT: control target
= control target key end

     0   :  { %8 = vsyncpa [#allocation3], 0  ;;  %s429_s0 = inlined_call_operand.hbm [shape: f32[8,32], index: 0, kind: input, shape index: {}]   ;;  %s430_s1 = inlined_call_operand.hbm [shape: bf16[2,32,256], index: 1, kind: input, shape index: {}]   ;;  %s431_s2 = inlined_call_operand.hbm [shape: f32[2,1,256], index: 2, kind: input, shape index: {}]   ;;  %s432_s3 = inlined_call_operand.hbm [shape: f32[8,32], index: 3, kind: output, shape index: {}]  }
   0x1   :  { %9 = vsyncpa [#allocation6], 0 }
   0x2   :  { %10 = vsyncpa [#allocation4], 0  ;;  %s385_s12 = smov [#allocation5]  }
   0x3   :  { %s26_s13 = sshll.u32 %s385_s12, 4  ;;  %s27_s13 = int_to_ptr.vmem [resolvable:$true] %s26_s13 }
   0x4   :  { %s307_s14 = scalar_lea.vmem %s27_s13, 1024  ;;  %p312_p1 = scmp.lt.s32.totalorder %s27_s13, %s27_s13 }
   0x5   :  { %p308_p0 = scmp.ne.s32.totalorder %s27_s13, %s307_s14  ;;  %p313_p2 = scmp.lt.s32.totalorder %s307_s14, %s307_s14 }
   0x7   :  { %p314_p3 = por %p313_p2, %p312_p1 }
   0x9   :  { %p315_p4 = pnand %p314_p3, %p308_p0 }
   0xb   :  { %318 = shalt.err (!%p315_p4)
}
   0xc   :  { %s386_s15 = smov 128   ;;  %s387_s16 = smov 8  }
   0xd   :  { %32 = dma.hbm_to_vmem [thread:$0]  %s430_s1, 1024, %s27_s13, [#allocation6], %s386_s15, %s386_s15, %s387_s16  }
   0xe   :  { %s388_s19 = smov [#allocation2]   ;;  %s389_s21 = smov [#allocation7]  }
   0xf   :  { %s17_s20 = sshll.u32 %s388_s19, 4  ;;  %s38_s22 = sshll.u32 %s389_s21, 4  ;;  %s18_s20 = int_to_ptr.vmem [resolvable:$true] %s17_s20  ;;  %s39_s22 = int_to_ptr.vmem [resolvable:$true] %s38_s22 }
  0x10   :  { %s327_s23 = scalar_lea.vmem %s18_s20, 128  ;;  %p332_p6 = scmp.lt.s32.totalorder %s18_s20, %s18_s20 }
  0x11   :  { %p328_p5 = scmp.ne.s32.totalorder %s18_s20, %s327_s23  ;;  %p333_p7 = scmp.lt.s32.totalorder %s327_s23, %s327_s23 }
  0x13   :  { %p334_p8 = por %p333_p7, %p332_p6 }
  0x15   :  { %p335_p9 = pnand %p334_p8, %p328_p5 }
  0x17   :  { %338 = shalt.err (!%p335_p9)
}
  0x18   :  { %20 = dma.hbm_to_vmem [thread:$0]  %s429_s0, 128, %s18_s20, [#allocation3]  }
  0x19   :  { %s347_s26 = scalar_lea.vmem %s39_s22, 64  ;;  %p352_p11 = scmp.lt.s32.totalorder %s39_s22, %s39_s22 }
  0x1a   :  { %p348_p10 = scmp.ne.s32.totalorder %s39_s22, %s347_s26  ;;  %p353_p12 = scmp.lt.s32.totalorder %s347_s26, %s347_s26 }
  0x1c   :  { %p354_p13 = por %p353_p12, %p352_p11 }
  0x1e   :  { %p355_p0 = pnand %p354_p13, %p348_p10 }
  0x20   :  { %358 = shalt.err (!%p355_p0)
}
  0x21   :  { %s390_s1 = smov 32   ;;  %s391_s27 = smov 2  }
  0x22   :  { %44 = dma.hbm_to_vmem [thread:$0]  %s431_s2, 64, %s39_s22, [#allocation6], %s390_s1, %s390_s1, %s391_s27  }
  0x23   :  { %379 = dma.done.wait [#allocation3], 128  }
  0x24   :  { %380 = vsyncadd [#allocation3], 4294967168 }
  0x25   :  { %381 = dma.done.wait [#allocation6], 1088  }
  0x26   :  { %382 = vsyncadd [#allocation6], 4294966208  ;;  %v392_v0 = vmov 0   ;;  %v279_v1 = vld [vmem:[#allocation5 + $0x14] ss:$8 sps:$4 sm:$0xff]   ;;  %vm93_vm0 = vcmask 261120   ;;  %v63_v11 = vlaneseq }
  0x27   :  { %129 = vmatprep.mubr.bf16.mxu0 %v392_v0  ;;  %222 = vmatprep.mubr.bf16.mxu1 %v392_v0  ;;  %v281_v2 = vld [vmem:[#allocation5 + $0x10] ss:$8 sps:$4 sm:$0xff]   ;;  %v282_v3 = vld [vmem:[#allocation5 + $0x4] ss:$8 sps:$4 sm:$0xff]   ;;  %v284_v4 = vld [vmem:[#allocation5] ss:$8 sps:$4 sm:$0xff]  }
  0x28   :  { %109 = vmatprep.subr.bf16.mxu0 %v279_v1  ;;  %v55_v5 = vld [vmem:[#allocation2] sm:$0xff]  ;;  %v288_v9 = vld [vmem:[#allocation5 + $0x24] ss:$8 sps:$4 sm:$0xff]   ;;  %v290_v10 = vld [vmem:[#allocation5 + $0x20] ss:$8 sps:$4 sm:$0xff]   ;;  %v64_v12 = vshrl.u32 %v63_v11, 7 }
  0x29   :  { %110 = vmatpush1.bf16.msra.mxu0 %v281_v2  ;;  %v56_v6 = vpack.c.bf16 %v55_v5, %v55_v5  ;;  %v285_v7 = vld [vmem:[#allocation5 + $0x34] ss:$8 sps:$4 sm:$0xff]   ;;  %v287_v8 = vld [vmem:[#allocation5 + $0x30] ss:$8 sps:$4 sm:$0xff]   ;;  %v61_v14 = vld [vmem:[#allocation7] sm:$0x3] }
  0x2a   :  { %111 = vmatprep.subr.bf16.mxu0 %v282_v3  ;;  %202 = vmatprep.subr.bf16.mxu1 %v285_v7  ;;  %v69_v13 = vsub.s32 1, %v64_v12  ;;  %v65_v22 = vsub.s32 0, %v64_v12  ;;  %v155_v33 = vld [vmem:[#allocation7 + $0x2] sm:$0x3]  ;;  %s393_s0 = smov [#allocation8]  }
  0x2b   :  { %203 = vmatpush1.bf16.msra.mxu1 %v287_v8  ;;  %s248_s2 = sshll.u32 %s393_s0, 4  ;;  %s249_s2 = int_to_ptr.vmem [resolvable:$true] %s248_s2 }
  0x2c   :  { %204 = vmatprep.subr.bf16.mxu1 %v288_v9  ;;  %v70_v15 = vrot.slane %v61_v14, %v69_v13  ;;  %v66_v25 = vrot.slane %v61_v14, %v65_v22  ;;  %v164_v34 = vrot.slane %v155_v33, %v69_v13  ;;  %v160_v43 = vrot.slane %v155_v33, %v65_v22  ;;  %s359_s30 = scalar_lea.vmem %s249_s2, 128  ;;  %p364_p2 = scmp.lt.s32.totalorder %s249_s2, %s249_s2 }
  0x2d   :  { %112 = vmatpush1.bf16.msra.mxu0 %v284_v4  ;;  %p360_p1 = scmp.ne.s32.totalorder %s249_s2, %s359_s30  ;;  %p365_p3 = scmp.lt.s32.totalorder %s359_s30, %s359_s30 }
  0x2f   :  { %205 = vmatpush1.bf16.msra.mxu1 %v290_v10  ;;  %p366_p4 = por %p365_p3, %p364_p2 }
  0x30   :  { %262 = vmatmul.mubr.msk.bf16.vlgmr.msra.gmra.mxu0 %vm93_vm0, %v56_v6 }
  0x31   :  { %p367_p5 = pnand %p366_p4, %p360_p1 }
  0xf0   :  { %v131_v16 = vpop.f32.mrf.mxu0 }
  0xf1   :  { %v132_v26 = vadd.f32 %v131_v16, %v66_v25 }
  0xf2   :  { %v133_v17 = vpop.f32.mrf.mxu0 }
  0xf3   :  { %v134_v18 = vadd.f32 %v133_v17, %v70_v15  ;;  %v138_v27 = vmax.f32 %v132_v26, 0.0 }
  0xf4   :  { %v135_v19 = vpop.f32.mrf.mxu0 }
  0xf5   :  { %v263_v20 = vmul.f32 -1.442695, %v134_v18  ;;  %v145_v28 = vsub.f32 %v55_v5, %v138_v27 }
  0xf6   :  { %v136_v21 = vpop.f32.mrf.mxu0 }
  0xf7   :  { %291 = vpow2.f32 %v263_v20 }
 0x104   :  { %v292_v23 = vpop.eup %291 }
 0x105   :  { %v142_v24 = vadd.f32 1.0, %v292_v23 }
 0x107   :  { %293 = vrcp.f32 %v142_v24 }
 0x114   :  { %v294_v29 = vpop.eup %293 }
 0x115   :  { %v146_v30 = vmul.f32 %v294_v29, %v145_v28 }
 0x117   :  { %v147_v31 = vadd.f32 %v146_v30, %v138_v27 }
 0x119   :  { %v148_v32 = vpack.c.bf16 %v147_v31, %v147_v31 }
 0x11b   :  { %268 = vmatmul.mubr.msk.bf16.vlgmr.msra.gmra.mxu1 %vm93_vm0, %v148_v32 }
 0x1db   :  { %v224_v35 = vpop.f32.mrf.mxu1 }
 0x1dc   :  { %v225_v44 = vadd.f32 %v224_v35, %v160_v43 }
 0x1dd   :  { %v226_v36 = vpop.f32.mrf.mxu1 }
 0x1de   :  { %v227_v37 = vadd.f32 %v226_v36, %v164_v34  ;;  %v231_v45 = vmax.f32 %v225_v44, 0.0 }
 0x1df   :  { %v228_v38 = vpop.f32.mrf.mxu1 }
 0x1e0   :  { %v269_v39 = vmul.f32 -1.442695, %v227_v37  ;;  %v238_v46 = vsub.f32 %v147_v31, %v231_v45 }
 0x1e1   :  { %v229_v40 = vpop.f32.mrf.mxu1 }
 0x1e2   :  { %295 = vpow2.f32 %v269_v39 }
 0x1ef   :  { %v296_v41 = vpop.eup %295 }
 0x1f0   :  { %v235_v42 = vadd.f32 1.0, %v296_v41 }
 0x1f2   :  { %297 = vrcp.f32 %v235_v42 }
 0x1ff   :  { %v298_v47 = vpop.eup %297 }
 0x200   :  { %v239_v48 = vmul.f32 %v298_v47, %v238_v46 }
 0x202   :  { %v240_v49 = vadd.f32 %v239_v48, %v231_v45 }
 0x204   :  { %241 = vst.msk [vmem:[#allocation8] sm:$0xff] %vm93_vm0, %v240_v49 }
 0x205   :  { %370 = shalt.err (!%p367_p5)
}
 0x206   :  { %251 = dma.vmem_to_hbm [thread:$0]  %s249_s2, 128, %s432_s3, [#allocation4]  }
 0x207   :  { %383 = dma.done.wait [#allocation4], 128  }
 0x208   :  { %384 = vsyncadd [#allocation4], 4294967168 }
 0x209   :  { %255 = vsyncpa [#allocation3], 1 }
 0x20a   :  { %256 = vsyncpa [#allocation6], 1 }
 0x20b   :  { %257 = vsyncpa [#allocation4], 1 }

</bundles_post_ra>
